<compile_context>
chip_gen: v7x
topology: tpu7x:2x2x1
jax: 0.10.0
libtpu: 0.0.40
codegen_flags: <defaults>
</compile_context>

<pallas_src>
import functools

import jax
import jax.numpy as jnp
from jax.experimental import pallas as pl
from jax.experimental.pallas import tpu as pltpu

HIDDEN = 64
GROUPS = 8                   # GroupNorm(64 // 8, 64)
GSIZE = HIDDEN // GROUPS     # 8 channels per group
GN_EPS = 1e-5
HEAD_W = 256                 # lane-padded fused head-1 width (mu|log_std|critic|pad)
OUT_W = 128                  # lane-dense fused output width (mu | std | value | pad)


def _round_up(v, m):
    return ((v + m - 1) // m) * m


def _group_avg_matrix(channels):
    """Block-diagonal (C, C) averaging matrix: P[i, j] = 1/GSIZE iff i, j share a group."""
    i = jnp.arange(channels)[:, None]
    j = jnp.arange(channels)[None, :]
    return ((i // GSIZE) == (j // GSIZE)).astype(jnp.float32) / GSIZE


def _gn_silu(h, p_avg, gamma, beta):
    """GroupNorm (groups of GSIZE contiguous channels) + SiLU.

    Statistics via one stacked matmul: [h ; h*h] (along the sublane axis) @ P, run in
    P's dtype (the compute dtype) with f32 accumulation. Normalize/affine/SiLU are f32.
    """
    tb = h.shape[0]
    cdt = p_avg.dtype
    hh = jnp.concatenate([h.astype(cdt), (h * h).astype(cdt)], axis=0)      # (2*TB, C)
    stats = jnp.dot(hh, p_avg, preferred_element_type=jnp.float32)          # (2*TB, C)
    mean_c = stats[:tb]                                                     # (TB, C)
    msq_c = stats[tb:]                                                      # (TB, C)
    var_c = jnp.maximum(msq_c - mean_c * mean_c, 0.0)                       # biased var
    y = (h - mean_c) * jax.lax.rsqrt(var_c + GN_EPS) * gamma + beta
    return y * jax.nn.sigmoid(y)                                            # SiLU


def actor_critic_kernel(
    x_ref,
    w1_ref, p64_ref, g1w_ref, g1b_ref,           # trunk
    wh1_ref, ph_ref, ghw_ref, ghb_ref,           # fused (lane-padded) head-1 + fused GN
    wh2_ref, bh2_ref,                            # fused (block-diagonal) head-2
    out_ref,                                     # (TB, OUT_W) fused output slab
    *, action_dim,
):
    cdt = w1_ref.dtype                           # compute dtype of matmul operands
    x = x_ref[...].astype(cdt)

    # trunk: Linear(obs, 64, bias=False) -> GroupNorm(8, 64) -> SiLU
    h0 = jnp.dot(x, w1_ref[...], preferred_element_type=jnp.float32)
    feat = _gn_silu(h0, p64_ref[...], g1w_ref[...], g1b_ref[...])

    # fused heads, first layer: [mu | log_std | critic | pad] -> (TB, 256), one GN+SiLU
    h1 = jnp.dot(feat.astype(cdt), wh1_ref[...], preferred_element_type=jnp.float32)
    h1 = _gn_silu(h1, ph_ref[...], ghw_ref[...], ghb_ref[...])

    # fused heads, second layer (block-diagonal weights) + fused bias -> (TB, OUT_W)
    raw = jnp.dot(h1.astype(cdt), wh2_ref[...], preferred_element_type=jnp.float32)
    raw = raw + bh2_ref[...]

    # columns [A, 2A) carry log_std -> std = softplus(clamp(., -2, 2)); rest pass through.
    col = jax.lax.broadcasted_iota(jnp.int32, (1, OUT_W), 1)
    is_std = jnp.logical_and(col >= action_dim, col < 2 * action_dim)
    clamped = jnp.clip(raw, -2.0, 2.0)
    out_ref[...] = jnp.where(is_std, jnp.log1p(jnp.exp(clamped)), raw)


def actor_critic_forward(x, params, *, block_b=2048, compute_dtype=jnp.bfloat16):
    """Whole ActorCritic forward in one Pallas call.

    Returns (mu, std, state_value) with shapes (B, A), (B, A), (B,).

    compute_dtype controls the MXU operand dtype (matmuls + GroupNorm-statistics
    matmuls), always with f32 accumulation. bf16 is recommended on ALL generations
    (v5e/v6e/v7x MXUs are natively bf16; f32 matmuls are multi-pass); GroupNorm
    normalize / affine / SiLU / softplus and the output slab always stay f32.
    """
    B, obs_dim = x.shape
    A = params["wm2"].shape[1]
    assert 2 * A + 1 <= OUT_W, "action_dim too large for the fused 128-wide output slab"

    # ---- host-side (trace-time) fusion of parameters -------------------------------
    p64 = _group_avg_matrix(HIDDEN).astype(compute_dtype)
    ph = _group_avg_matrix(HEAD_W).astype(compute_dtype)

    pad_w = HEAD_W - 3 * HIDDEN          # 64 zero-padded channels (stay exactly 0)
    w1 = params["w1"].astype(compute_dtype)
    wh1 = jnp.concatenate(
        [params["wm1"], params["wl1"], params["wc1"],
         jnp.zeros((HIDDEN, pad_w), jnp.float32)], axis=1).astype(compute_dtype)
    ghw = jnp.concatenate([params["gmw"], params["glw"], params["gcw"],
                           jnp.ones((1, pad_w), jnp.float32)], axis=1)
    ghb = jnp.concatenate([params["gmb"], params["glb"], params["gcb"],
                           jnp.zeros((1, pad_w), jnp.float32)], axis=1)

    # block-diagonal fused second-layer weights, lane-padded to OUT_W
    wh2 = jnp.zeros((HEAD_W, OUT_W), jnp.float32)
    wh2 = wh2.at[0:HIDDEN, 0:A].set(params["wm2"])
    wh2 = wh2.at[HIDDEN:2 * HIDDEN, A:2 * A].set(params["wl2"])
    wh2 = wh2.at[2 * HIDDEN:3 * HIDDEN, 2 * A:2 * A + 1].set(params["wc2"])
    wh2 = wh2.astype(compute_dtype)
    bh2 = jnp.zeros((1, OUT_W), jnp.float32)
    bh2 = bh2.at[:, 0:A].set(params["bm2"])
    bh2 = bh2.at[:, A:2 * A].set(params["bl2"])
    bh2 = bh2.at[:, 2 * A:2 * A + 1].set(params["bc2"])

    # ---- batch tiling ---------------------------------------------------------------
    # tb derived from B (even split, multiple of 8) to avoid pathological padding; force
    # >= 2 tiles whenever B >= 16 so v7x's second TensorCore gets work (harmless on
    # single-TC v5e/v6e: one extra ~0.35 us grid step).
    n_tiles = max(1, (B + block_b - 1) // block_b)
    if B >= 16 and n_tiles < 2:
        n_tiles = 2
    tb = _round_up((B + n_tiles - 1) // n_tiles, 8)
    b_pad = tb * n_tiles
    xp = x if b_pad == B else jnp.pad(x, ((0, b_pad - B), (0, 0)))

    row = lambda i: (i, 0)      # streamed x / out tiles
    const = lambda i: (0, 0)    # VMEM-resident weights (DMA'd once, reused every step)
    # TODO(synk): single-buffer the constant weight blocks (pipeline_mode=pl.Buffered(1))
    # for extra v7x VMEM headroom once validated on the target jax version (marginal).

    weight_arrays = (w1, p64, params["g1w"], params["g1b"],
                     wh1, ph, ghw, ghb, wh2, bh2)
    in_specs = [pl.BlockSpec((tb, obs_dim), row)] + [
        pl.BlockSpec(a.shape, const) for a in weight_arrays
    ]

    weight_bytes = sum(int(a.size) * a.dtype.itemsize for a in weight_arrays)

    # advisory cost estimate so XLA can schedule surrounding PPO ops around this call
    flops = 2 * b_pad * (
        obs_dim * HIDDEN                 # trunk linear
        + 2 * HIDDEN * HIDDEN            # trunk GN stats (stacked [h;h*h] @ P)
        + HIDDEN * HEAD_W                # fused head-1 linear
        + 2 * HEAD_W * HEAD_W            # fused head GN stats
        + HEAD_W * OUT_W)                # fused head-2 linear
    transcendentals = b_pad * (2 * (HIDDEN + HEAD_W) + 2 * OUT_W)
    bytes_accessed = b_pad * (obs_dim + OUT_W) * 4 + weight_bytes

    # Explicit VMEM budget: >= 32 MiB (v5e scoped default is only 16 MiB, which is the
    # first limit hit at large tiles), capped at 48 MiB to leave headroom inside v7x's
    # 64 MiB physical VMEM. v6e/v5e have 128 MiB physical, so the cap is always safe.
    vmem_est = (2 * tb * obs_dim * 4            # double-buffered x tiles
                + 2 * tb * OUT_W * 4            # double-buffered out tiles
                + 2 * weight_bytes              # weight blocks
                + 10 * tb * HEAD_W * 4)         # in-kernel intermediates headroom
    vmem_limit = int(min(max(vmem_est, 32 << 20), 48 << 20))

    out = pl.pallas_call(
        functools.partial(actor_critic_kernel, action_dim=A),
        out_shape=jax.ShapeDtypeStruct((b_pad, OUT_W), jnp.float32),
        grid=(n_tiles,),
        in_specs=in_specs,
        out_specs=pl.BlockSpec((tb, OUT_W), row),
        compiler_params=pltpu.CompilerParams(
            dimension_semantics=("parallel",),   # v7x: split batch tiles across 2 TCs
            vmem_limit_bytes=vmem_limit),
        cost_estimate=pl.CostEstimate(
            flops=flops,
            transcendentals=transcendentals,
            bytes_accessed=bytes_accessed),
    )(xp, *weight_arrays)

    mu = out[:B, 0:A]
    std = out[:B, A:2 * A]
    val = out[:B, 2 * A]
    return mu, std, val


def init_params(key, observ_dim, action_dim):
    """Deterministic init matching the PyTorch init_weights semantics:
    xavier_uniform for Linear weights, N(0, 0.01) for Linear biases,
    ones/zeros for GroupNorm affine."""
    def xavier(key, fan_in, fan_out):
        bound = jnp.sqrt(6.0 / (fan_in + fan_out))
        return jax.random.uniform(key, (fan_in, fan_out), jnp.float32, -bound, bound)

    keys = jax.random.split(key, 12)
    ones64 = jnp.ones((1, HIDDEN), jnp.float32)
    zeros64 = jnp.zeros((1, HIDDEN), jnp.float32)
    p = {
        # trunk
        "w1": xavier(keys[0], observ_dim, HIDDEN),
        "g1w": ones64, "g1b": zeros64,
        # mu head
        "wm1": xavier(keys[1], HIDDEN, HIDDEN),
        "gmw": ones64, "gmb": zeros64,
        "wm2": xavier(keys[2], HIDDEN, action_dim),
        "bm2": 0.01 * jax.random.normal(keys[3], (1, action_dim), jnp.float32),
        # log_std head
        "wl1": xavier(keys[4], HIDDEN, HIDDEN),
        "glw": ones64, "glb": zeros64,
        "wl2": xavier(keys[5], HIDDEN, action_dim),
        "bl2": 0.01 * jax.random.normal(keys[6], (1, action_dim), jnp.float32),
        # critic head
        "wc1": xavier(keys[7], HIDDEN, HIDDEN),
        "gcw": ones64, "gcb": zeros64,
        "wc2": xavier(keys[8], HIDDEN, 1),
        "bc2": 0.01 * jax.random.normal(keys[9], (1, 1), jnp.float32),
    }
    return p


def _reference_forward(x, p):
    """Pure-JAX f32 reference mirroring the PyTorch module semantics."""
    def gn_silu(h, g, b):
        B, C = h.shape
        hr = h.reshape(B, C // GSIZE, GSIZE)
        mean = hr.mean(-1, keepdims=True)
        var = ((hr - mean) ** 2).mean(-1, keepdims=True)
        hn = ((hr - mean) / jnp.sqrt(var + GN_EPS)).reshape(B, C)
        y = hn * g + b
        return y * jax.nn.sigmoid(y)

    feat = gn_silu(x @ p["w1"], p["g1w"], p["g1b"])
    mu = gn_silu(feat @ p["wm1"], p["gmw"], p["gmb"]) @ p["wm2"] + p["bm2"]
    ls = gn_silu(feat @ p["wl1"], p["glw"], p["glb"]) @ p["wl2"] + p["bl2"]
    std = jax.nn.softplus(jnp.clip(ls, -2.0, 2.0))
    val = gn_silu(feat @ p["wc1"], p["gcw"], p["gcb"]) @ p["wc2"] + p["bc2"]
    return mu, std, val[:, 0]


if __name__ == "__main__":
    OBS_DIM, ACT_DIM = 32, 4

    key = jax.random.PRNGKey(0)
    k_x1, k_x2, k_p = jax.random.split(key, 3)
    params = init_params(k_p, OBS_DIM, ACT_DIM)

    # ---- f32 path, small single-tile batch (exact vs. reference) --------------------
    B1 = 8
    x1 = jax.random.normal(k_x1, (B1, OBS_DIM), jnp.float32)
    mu, std, value = actor_critic_forward(x1, params, compute_dtype=jnp.float32)
    jax.block_until_ready((mu, std, value))

    mu_r, std_r, val_r = _reference_forward(x1, params)
    assert mu.shape == (B1, ACT_DIM) and std.shape == (B1, ACT_DIM) and value.shape == (B1,)
    assert jnp.allclose(mu, mu_r, atol=1e-4, rtol=1e-4)
    assert jnp.allclose(std, std_r, atol=1e-4, rtol=1e-4)
    assert jnp.allclose(value, val_r, atol=1e-4, rtol=1e-4)

    # ---- bf16 matmul-operand path, multi-tile batch (>=2 grid steps, padded rows) ---
    B2 = 48
    x2 = jax.random.normal(k_x2, (B2, OBS_DIM), jnp.float32)
    mu_b, std_b, val_b = actor_critic_forward(x2, params, compute_dtype=jnp.bfloat16)
    jax.block_until_ready((mu_b, std_b, val_b))

    mu_r2, std_r2, val_r2 = _reference_forward(x2, params)
    assert mu_b.shape == (B2, ACT_DIM) and std_b.shape == (B2, ACT_DIM) and val_b.shape == (B2,)
    assert jnp.allclose(mu_b, mu_r2, atol=5e-2, rtol=5e-2)
    assert jnp.allclose(std_b, std_r2, atol=5e-2, rtol=5e-2)
    assert jnp.allclose(val_b, val_r2, atol=5e-2, rtol=5e-2)

    print("KERNEL_OK")
</pallas_src>

<mosaic_0001>
module attributes {stable_mosaic.version = 11 : i64} {
  func.func @actor_critic_kernel(%arg0: i32, %arg1: memref<8x32xf32, #tpu.memory_space<vmem>>, %arg2: memref<32x64xf32, #tpu.memory_space<vmem>>, %arg3: memref<64x64xf32, #tpu.memory_space<vmem>>, %arg4: memref<1x64xf32, #tpu.memory_space<vmem>>, %arg5: memref<1x64xf32, #tpu.memory_space<vmem>>, %arg6: memref<64x256xf32, #tpu.memory_space<vmem>>, %arg7: memref<256x256xf32, #tpu.memory_space<vmem>>, %arg8: memref<1x256xf32, #tpu.memory_space<vmem>>, %arg9: memref<1x256xf32, #tpu.memory_space<vmem>>, %arg10: memref<256x128xf32, #tpu.memory_space<vmem>>, %arg11: memref<1x128xf32, #tpu.memory_space<vmem>>, %arg12: memref<8x128xf32, #tpu.memory_space<vmem>>) attributes {dimension_semantics = [#tpu.dimension_semantics<parallel>], iteration_bounds = array<i64: 1>, scalar_prefetch = 0 : i64, scratch_operands = 0 : i64, tpu.core_type = #tpu.core_type<tc>, window_params = [{transform_indices = @transform_0, window_bounds = array<i64: 8, 32>}, {pipeline_mode = #tpu.pipeline_mode<synchronous>, transform_indices = @transform_1, window_bounds = array<i64: 32, 64>}, {pipeline_mode = #tpu.pipeline_mode<synchronous>, transform_indices = @transform_2, window_bounds = array<i64: 64, 64>}, {pipeline_mode = #tpu.pipeline_mode<synchronous>, transform_indices = @transform_3, window_bounds = array<i64: 1, 64>}, {pipeline_mode = #tpu.pipeline_mode<synchronous>, transform_indices = @transform_4, window_bounds = array<i64: 1, 64>}, {pipeline_mode = #tpu.pipeline_mode<synchronous>, transform_indices = @transform_5, window_bounds = array<i64: 64, 256>}, {pipeline_mode = #tpu.pipeline_mode<synchronous>, transform_indices = @transform_6, window_bounds = array<i64: 256, 256>}, {pipeline_mode = #tpu.pipeline_mode<synchronous>, transform_indices = @transform_7, window_bounds = array<i64: 1, 256>}, {pipeline_mode = #tpu.pipeline_mode<synchronous>, transform_indices = @transform_8, window_bounds = array<i64: 1, 256>}, {pipeline_mode = #tpu.pipeline_mode<synchronous>, transform_indices = @transform_9, window_bounds = array<i64: 256, 128>}, {pipeline_mode = #tpu.pipeline_mode<synchronous>, transform_indices = @transform_10, window_bounds = array<i64: 1, 128>}, {transform_indices = @transform_11, window_bounds = array<i64: 8, 128>}]} {
    %c0 = arith.constant 0 : index
    %c0_0 = arith.constant 0 : index
    %0 = vector.load %arg1[%c0, %c0_0] : memref<8x32xf32, #tpu.memory_space<vmem>>, vector<8x32xf32>
    %c0_1 = arith.constant 0 : index
    %c0_2 = arith.constant 0 : index
    %1 = vector.load %arg2[%c0_1, %c0_2] : memref<32x64xf32, #tpu.memory_space<vmem>>, vector<32x64xf32>
    %cst = arith.constant dense<0.000000e+00> : vector<8x64xf32>
    %2 = tpu.matmul %0, %1, %cst {dimension_numbers = #tpu.dot_dimension_numbers<[1], [0], [0], [1], [0, 0, 1, 1], [], []>} : vector<8x32xf32>, vector<32x64xf32>, vector<8x64xf32> -> vector<8x64xf32>
    %c0_3 = arith.constant 0 : index
    %c0_4 = arith.constant 0 : index
    %3 = vector.load %arg3[%c0_3, %c0_4] : memref<64x64xf32, #tpu.memory_space<vmem>>, vector<64x64xf32>
    %c0_5 = arith.constant 0 : index
    %c0_6 = arith.constant 0 : index
    %4 = vector.load %arg4[%c0_5, %c0_6] : memref<1x64xf32, #tpu.memory_space<vmem>>, vector<1x64xf32>
    %c0_7 = arith.constant 0 : index
    %c0_8 = arith.constant 0 : index
    %5 = vector.load %arg5[%c0_7, %c0_8] : memref<1x64xf32, #tpu.memory_space<vmem>>, vector<1x64xf32>
    %6 = arith.mulf %2, %2 : vector<8x64xf32>
    %7 = tpu.concatenate %2, %6 in 0 : vector<8x64xf32>, vector<8x64xf32> -> vector<16x64xf32>
    %cst_9 = arith.constant dense<0.000000e+00> : vector<16x64xf32>
    %8 = tpu.matmul %7, %3, %cst_9 {dimension_numbers = #tpu.dot_dimension_numbers<[1], [0], [0], [1], [0, 0, 1, 1], [], []>} : vector<16x64xf32>, vector<64x64xf32>, vector<16x64xf32> -> vector<16x64xf32>
    %9 = vector.extract_strided_slice %8 {offsets = [0, 0], sizes = [8, 64], strides = [1, 1]} : vector<16x64xf32> to vector<8x64xf32>
    %10 = vector.extract_strided_slice %8 {offsets = [8, 0], sizes = [8, 64], strides = [1, 1]} : vector<16x64xf32> to vector<8x64xf32>
    %11 = arith.mulf %9, %9 : vector<8x64xf32>
    %12 = arith.subf %10, %11 : vector<8x64xf32>
    %cst_10 = arith.constant 0.000000e+00 : f32
    %13 = vector.broadcast %cst_10 : f32 to vector<8x64xf32>
    %14 = arith.maximumf %12, %13 : vector<8x64xf32>
    %15 = arith.subf %2, %9 : vector<8x64xf32>
    %cst_11 = arith.constant 9.99999974E-6 : f32
    %16 = vector.broadcast %cst_11 : f32 to vector<8x64xf32>
    %17 = arith.addf %14, %16 : vector<8x64xf32>
    %18 = math.rsqrt %17 : vector<8x64xf32>
    %19 = arith.mulf %15, %18 : vector<8x64xf32>
    %20 = vector.broadcast %4 : vector<1x64xf32> to vector<8x64xf32>
    %21 = arith.mulf %19, %20 : vector<8x64xf32>
    %22 = vector.broadcast %5 : vector<1x64xf32> to vector<8x64xf32>
    %23 = arith.addf %21, %22 : vector<8x64xf32>
    %24 = arith.negf %23 : vector<8x64xf32>
    %25 = math.exp %24 : vector<8x64xf32>
    %cst_12 = arith.constant 1.000000e+00 : f32
    %26 = vector.broadcast %cst_12 : f32 to vector<8x64xf32>
    %27 = arith.addf %26, %25 : vector<8x64xf32>
    %28 = arith.divf %26, %27 : vector<8x64xf32>
    %29 = arith.mulf %23, %28 : vector<8x64xf32>
    %c0_13 = arith.constant 0 : index
    %c0_14 = arith.constant 0 : index
    %30 = vector.load %arg6[%c0_13, %c0_14] : memref<64x256xf32, #tpu.memory_space<vmem>>, vector<64x256xf32>
    %cst_15 = arith.constant dense<0.000000e+00> : vector<8x256xf32>
    %31 = tpu.matmul %29, %30, %cst_15 {dimension_numbers = #tpu.dot_dimension_numbers<[1], [0], [0], [1], [0, 0, 1, 1], [], []>} : vector<8x64xf32>, vector<64x256xf32>, vector<8x256xf32> -> vector<8x256xf32>
    %c0_16 = arith.constant 0 : index
    %c0_17 = arith.constant 0 : index
    %32 = vector.load %arg7[%c0_16, %c0_17] : memref<256x256xf32, #tpu.memory_space<vmem>>, vector<256x256xf32>
    %c0_18 = arith.constant 0 : index
    %c0_19 = arith.constant 0 : index
    %33 = vector.load %arg8[%c0_18, %c0_19] : memref<1x256xf32, #tpu.memory_space<vmem>>, vector<1x256xf32>
    %c0_20 = arith.constant 0 : index
    %c0_21 = arith.constant 0 : index
    %34 = vector.load %arg9[%c0_20, %c0_21] : memref<1x256xf32, #tpu.memory_space<vmem>>, vector<1x256xf32>
    %35 = arith.mulf %31, %31 : vector<8x256xf32>
    %36 = tpu.concatenate %31, %35 in 0 : vector<8x256xf32>, vector<8x256xf32> -> vector<16x256xf32>
    %cst_22 = arith.constant dense<0.000000e+00> : vector<16x256xf32>
    %37 = tpu.matmul %36, %32, %cst_22 {dimension_numbers = #tpu.dot_dimension_numbers<[1], [0], [0], [1], [0, 0, 1, 1], [], []>} : vector<16x256xf32>, vector<256x256xf32>, vector<16x256xf32> -> vector<16x256xf32>
    %38 = vector.extract_strided_slice %37 {offsets = [0, 0], sizes = [8, 256], strides = [1, 1]} : vector<16x256xf32> to vector<8x256xf32>
    %39 = vector.extract_strided_slice %37 {offsets = [8, 0], sizes = [8, 256], strides = [1, 1]} : vector<16x256xf32> to vector<8x256xf32>
    %40 = arith.mulf %38, %38 : vector<8x256xf32>
    %41 = arith.subf %39, %40 : vector<8x256xf32>
    %cst_23 = arith.constant 0.000000e+00 : f32
    %42 = vector.broadcast %cst_23 : f32 to vector<8x256xf32>
    %43 = arith.maximumf %41, %42 : vector<8x256xf32>
    %44 = arith.subf %31, %38 : vector<8x256xf32>
    %cst_24 = arith.constant 9.99999974E-6 : f32
    %45 = vector.broadcast %cst_24 : f32 to vector<8x256xf32>
    %46 = arith.addf %43, %45 : vector<8x256xf32>
    %47 = math.rsqrt %46 : vector<8x256xf32>
    %48 = arith.mulf %44, %47 : vector<8x256xf32>
    %49 = vector.broadcast %33 : vector<1x256xf32> to vector<8x256xf32>
    %50 = arith.mulf %48, %49 : vector<8x256xf32>
    %51 = vector.broadcast %34 : vector<1x256xf32> to vector<8x256xf32>
    %52 = arith.addf %50, %51 : vector<8x256xf32>
    %53 = arith.negf %52 : vector<8x256xf32>
    %54 = math.exp %53 : vector<8x256xf32>
    %cst_25 = arith.constant 1.000000e+00 : f32
    %55 = vector.broadcast %cst_25 : f32 to vector<8x256xf32>
    %56 = arith.addf %55, %54 : vector<8x256xf32>
    %57 = arith.divf %55, %56 : vector<8x256xf32>
    %58 = arith.mulf %52, %57 : vector<8x256xf32>
    %c0_26 = arith.constant 0 : index
    %c0_27 = arith.constant 0 : index
    %59 = vector.load %arg10[%c0_26, %c0_27] : memref<256x128xf32, #tpu.memory_space<vmem>>, vector<256x128xf32>
    %cst_28 = arith.constant dense<0.000000e+00> : vector<8x128xf32>
    %60 = tpu.matmul %58, %59, %cst_28 {dimension_numbers = #tpu.dot_dimension_numbers<[1], [0], [0], [1], [0, 0, 1, 1], [], []>} : vector<8x256xf32>, vector<256x128xf32>, vector<8x128xf32> -> vector<8x128xf32>
    %c0_29 = arith.constant 0 : index
    %c0_30 = arith.constant 0 : index
    %61 = vector.load %arg11[%c0_29, %c0_30] : memref<1x128xf32, #tpu.memory_space<vmem>>, vector<1x128xf32>
    %62 = vector.broadcast %61 : vector<1x128xf32> to vector<8x128xf32>
    %63 = arith.addf %60, %62 : vector<8x128xf32>
    %64 = tpu.iota {dimensions = array<i32: 1>} : vector<1x128xi32>
    %c4_i32 = arith.constant 4 : i32
    %65 = vector.broadcast %c4_i32 : i32 to vector<1x128xi32>
    %66 = arith.cmpi sge, %64, %65 : vector<1x128xi32>
    %c8_i32 = arith.constant 8 : i32
    %67 = vector.broadcast %c8_i32 : i32 to vector<1x128xi32>
    %68 = arith.cmpi slt, %64, %67 : vector<1x128xi32>
    %69 = arith.andi %66, %68 : vector<1x128xi1>
    %cst_31 = arith.constant -2.000000e+00 : f32
    %cst_32 = arith.constant 2.000000e+00 : f32
    %70 = vector.broadcast %cst_31 : f32 to vector<8x128xf32>
    %71 = arith.maximumf %70, %63 : vector<8x128xf32>
    %72 = vector.broadcast %cst_32 : f32 to vector<8x128xf32>
    %73 = arith.minimumf %72, %71 : vector<8x128xf32>
    %74 = math.exp %73 : vector<8x128xf32>
    %75 = math.log1p %74 : vector<8x128xf32>
    %76 = vector.shape_cast %69 : vector<1x128xi1> to vector<1x128xi1>
    %77 = vector.broadcast %76 : vector<1x128xi1> to vector<8x128xi1>
    %78 = arith.select %77, %75, %63 : vector<8x128xi1>, vector<8x128xf32>
    %c0_33 = arith.constant 0 : index
    %c0_34 = arith.constant 0 : index
    %79 = vector.load %arg12[%c0_33, %c0_34] : memref<8x128xf32, #tpu.memory_space<vmem>>, vector<8x128xf32>
    tpu.vector_store %arg12[%c0_33, %c0_34], %78 {strides = array<i32>} : memref<8x128xf32, #tpu.memory_space<vmem>>, vector<8x128xf32>,
    return
  }
  func.func @transform_0(%arg0: i32) -> (i32, i32) {
    %c0_i32 = arith.constant 0 : i32
    %c0_i32_0 = arith.constant 0 : i32
    return %arg0, %c0_i32 : i32, i32
  }
  func.func @transform_1(%arg0: i32) -> (i32, i32) {
    %c0_i32 = arith.constant 0 : i32
    %c0_i32_0 = arith.constant 0 : i32
    %c0_i32_1 = arith.constant 0 : i32
    return %c0_i32, %c0_i32_0 : i32, i32
  }
  func.func @transform_2(%arg0: i32) -> (i32, i32) {
    %c0_i32 = arith.constant 0 : i32
    %c0_i32_0 = arith.constant 0 : i32
    %c0_i32_1 = arith.constant 0 : i32
    return %c0_i32, %c0_i32_0 : i32, i32
  }
  func.func @transform_3(%arg0: i32) -> (i32, i32) {
    %c0_i32 = arith.constant 0 : i32
    %c0_i32_0 = arith.constant 0 : i32
    %c0_i32_1 = arith.constant 0 : i32
    return %c0_i32, %c0_i32_0 : i32, i32
  }
  func.func @transform_4(%arg0: i32) -> (i32, i32) {
    %c0_i32 = arith.constant 0 : i32
    %c0_i32_0 = arith.constant 0 : i32
    %c0_i32_1 = arith.constant 0 : i32
    return %c0_i32, %c0_i32_0 : i32, i32
  }
  func.func @transform_5(%arg0: i32) -> (i32, i32) {
    %c0_i32 = arith.constant 0 : i32
    %c0_i32_0 = arith.constant 0 : i32
    %c0_i32_1 = arith.constant 0 : i32
    return %c0_i32, %c0_i32_0 : i32, i32
  }
  func.func @transform_6(%arg0: i32) -> (i32, i32) {
    %c0_i32 = arith.constant 0 : i32
    %c0_i32_0 = arith.constant 0 : i32
    %c0_i32_1 = arith.constant 0 : i32
    return %c0_i32, %c0_i32_0 : i32, i32
  }
  func.func @transform_7(%arg0: i32) -> (i32, i32) {
    %c0_i32 = arith.constant 0 : i32
    %c0_i32_0 = arith.constant 0 : i32
    %c0_i32_1 = arith.constant 0 : i32
    return %c0_i32, %c0_i32_0 : i32, i32
  }
  func.func @transform_8(%arg0: i32) -> (i32, i32) {
    %c0_i32 = arith.constant 0 : i32
    %c0_i32_0 = arith.constant 0 : i32
    %c0_i32_1 = arith.constant 0 : i32
    return %c0_i32, %c0_i32_0 : i32, i32
  }
  func.func @transform_9(%arg0: i32) -> (i32, i32) {
    %c0_i32 = arith.constant 0 : i32
    %c0_i32_0 = arith.constant 0 : i32
    %c0_i32_1 = arith.constant 0 : i32
    return %c0_i32, %c0_i32_0 : i32, i32
  }
  func.func @transform_10(%arg0: i32) -> (i32, i32) {
    %c0_i32 = arith.constant 0 : i32
    %c0_i32_0 = arith.constant 0 : i32
    %c0_i32_1 = arith.constant 0 : i32
    return %c0_i32, %c0_i32_0 : i32, i32
  }
  func.func @transform_11(%arg0: i32) -> (i32, i32) {
    %c0_i32 = arith.constant 0 : i32
    %c0_i32_0 = arith.constant 0 : i32
    return %arg0, %c0_i32 : i32, i32
  }
}

</mosaic_0001>

<bundles_post_ra>
// kernel: tpu_custom_call.1
= control target key start
LH: loop header
LB: loop body
LE: loop exit
PB: predicated region body
PF: predicated region fallthrough
CT: control target
= control target key end

     0   :  { %16 = vsyncpa [#allocation3], 0  ;;  %s1405_s0 = inlined_call_operand.hbm [shape: f32[8,32], index: 0, kind: input, shape index: {}]   ;;  %s1406_s1 = inlined_call_operand.hbm [shape: f32[32,64], index: 1, kind: input, shape index: {}]   ;;  %s1407_s2 = inlined_call_operand.hbm [shape: f32[64,64], index: 2, kind: input, shape index: {}]   ;;  %s1408_s3 = inlined_call_operand.vmem [shape: f32[1,64], index: 3, kind: input, shape index: {}]   ;;  %s1409_s4 = inlined_call_operand.vmem [shape: f32[1,64], index: 4, kind: input, shape index: {}]   ;;  %s1410_s5 = inlined_call_operand.hbm [shape: f32[64,256], index: 5, kind: input, shape index: {}]   ;;  %s1411_s6 = inlined_call_operand.hbm [shape: f32[256,256], index: 6, kind: input, shape index: {}]   ;;  %s1412_s7 = inlined_call_operand.vmem [shape: f32[1,256], index: 7, kind: input, shape index: {}]   ;;  %s1413_s8 = inlined_call_operand.vmem [shape: f32[1,256], index: 8, kind: input, shape index: {}]   ;;  %s1414_s9 = inlined_call_operand.hbm [shape: f32[256,128], index: 9, kind: input, shape index: {}]   ;;  %s1415_s10 = inlined_call_operand.vmem [shape: f32[1,128], index: 10, kind: input, shape index: {}]   ;;  %s1416_s11 = inlined_call_operand.hbm [shape: f32[8,128], index: 11, kind: output, shape index: {}]  }
   0x1   :  { %17 = vsyncpa [#allocation6], 0 }
   0x2   :  { %18 = vsyncpa [#allocation9], 0 }
   0x3   :  { %19 = vsyncpa [#allocation12], 0 }
   0x4   :  { %20 = vsyncpa [#allocation4], 0  ;;  %s1182_s17 = smov [#allocation5]   ;;  %s1018_s21 = scalar_lea.hbm %s1406_s1, 512 }
   0x5   :  { %s36_s18 = sshll.u32 %s1182_s17, 4  ;;  %p1019_p0 = scmp.ne.s32.totalorder %s1406_s1, %s1018_s21  ;;  %s37_s18 = int_to_ptr.vmem [resolvable:$true] %s36_s18 }
   0x6   :  { %p1022_p1 = scmp.lt.u32.totalorder %s1018_s21, %s1406_s1 }
   0x8   :  { %p1024_p2 = pnand %p1022_p1, %p1019_p0 }
   0xa   :  { %1027 = shalt.err (!%p1024_p2)
}
   0xb   :  { %s1028_s26 = scalar_lea.vmem %s37_s18, 512  ;;  %p1033_p4 = scmp.lt.s32.totalorder %s37_s18, %s37_s18 }
   0xc   :  { %p1029_p3 = scmp.ne.s32.totalorder %s37_s18, %s1028_s26  ;;  %p1034_p5 = scmp.lt.s32.totalorder %s1028_s26, %s1028_s26 }
   0xe   :  { %p1035_p6 = por %p1034_p5, %p1033_p4 }
  0x10   :  { %p1036_p7 = pnand %p1035_p6, %p1029_p3 }
  0x12   :  { %1039 = shalt.err (!%p1036_p7)
}
  0x13   :  { %s1183_s27 = smov 128   ;;  %s1184_s28 = smov 8  }
  0x14   :  { %42 = dma.hbm_to_vmem [thread:$0]  %s1406_s1, 512, %s37_s18, [#allocation6], %s1183_s27, %s1183_s27, %s1184_s28  }
  0x15   :  { %s1185_s12 = smov [#allocation8]   ;;  %s1040_s16 = scalar_lea.hbm %s1410_s5, 2048 }
  0x16   :  { %s64_s13 = sshll.u32 %s1185_s12, 4  ;;  %p1041_p8 = scmp.ne.s32.totalorder %s1410_s5, %s1040_s16  ;;  %s65_s13 = int_to_ptr.vmem [resolvable:$true] %s64_s13 }
  0x17   :  { %p1044_p9 = scmp.lt.u32.totalorder %s1040_s16, %s1410_s5 }
  0x19   :  { %p1046_p10 = pnand %p1044_p9, %p1041_p8 }
  0x1b   :  { %1049 = shalt.err (!%p1046_p10)
}
  0x1c   :  { %s1050_s22 = scalar_lea.vmem %s65_s13, 2048  ;;  %p1055_p12 = scmp.lt.s32.totalorder %s65_s13, %s65_s13 }
  0x1d   :  { %p1051_p11 = scmp.ne.s32.totalorder %s65_s13, %s1050_s22  ;;  %p1056_p13 = scmp.lt.s32.totalorder %s1050_s22, %s1050_s22 }
  0x1f   :  { %p1057_p0 = por %p1056_p13, %p1055_p12 }
  0x21   :  { %p1058_p1 = pnand %p1057_p0, %p1051_p11 }
  0x23   :  { %1061 = shalt.err (!%p1058_p1)
}
  0x24   :  { %s1186_s1 = smov 256   ;;  %s1187_s18 = smov 16  }
  0x25   :  { %70 = dma.hbm_to_vmem [thread:$0]  %s1410_s5, 2048, %s65_s13, [#allocation9], %s1186_s1, %s1186_s1, %s1187_s18  }
  0x26   :  { %s1188_s25 = smov [#allocation2]   ;;  %s1189_s29 = smov [#allocation7]  }
  0x27   :  { %s27_s26 = sshll.u32 %s1188_s25, 4  ;;  %s48_s30 = sshll.u32 %s1189_s29, 4  ;;  %s28_s26 = int_to_ptr.vmem [resolvable:$true] %s27_s26  ;;  %s1286_s30 = int_to_ptr.vmem [resolvable:$true] %s48_s30 }
  0x28   :  { %s1062_s15 = scalar_lea.hbm %s1405_s0, 128 }
  0x29   :  { %p1063_p2 = scmp.ne.s32.totalorder %s1405_s0, %s1062_s15  ;;  %p1066_p3 = scmp.lt.u32.totalorder %s1062_s15, %s1405_s0 }
  0x2b   :  { %p1068_p4 = pnand %p1066_p3, %p1063_p2 }
  0x2d   :  { %1071 = shalt.err (!%p1068_p4)
}
  0x2e   :  { %s1072_s5 = scalar_lea.vmem %s28_s26, 128  ;;  %p1077_p6 = scmp.lt.s32.totalorder %s28_s26, %s28_s26 }
  0x2f   :  { %p1073_p5 = scmp.ne.s32.totalorder %s28_s26, %s1072_s5  ;;  %p1078_p7 = scmp.lt.s32.totalorder %s1072_s5, %s1072_s5 }
  0x31   :  { %p1079_p8 = por %p1078_p7, %p1077_p6 }
  0x33   :  { %p1080_p9 = pnand %p1079_p8, %p1073_p5 }
  0x35   :  { %1083 = shalt.err (!%p1080_p9)
}
  0x36   :  { %30 = dma.hbm_to_vmem [thread:$0]  %s1405_s0, 128, %s28_s26, [#allocation3]  }
  0x37   :  { %s1084_s24 = scalar_lea.hbm %s1407_s2, 1024 }
  0x38   :  { %p1085_p10 = scmp.ne.s32.totalorder %s1407_s2, %s1084_s24  ;;  %p1088_p11 = scmp.lt.u32.totalorder %s1084_s24, %s1407_s2 }
  0x3a   :  { %p1090_p12 = pnand %p1088_p11, %p1085_p10 }
  0x3c   :  { %1093 = shalt.err (!%p1090_p12)
}
  0x3d   :  { %s1094_s15 = scalar_lea.vmem %s1286_s30, 1024  ;;  %p1099_p0 = scmp.lt.s32.totalorder %s1286_s30, %s1286_s30 }
  0x3e   :  { %p1095_p13 = scmp.ne.s32.totalorder %s1286_s30, %s1094_s15  ;;  %p1100_p1 = scmp.lt.s32.totalorder %s1094_s15, %s1094_s15 }
  0x40   :  { %p1101_p2 = por %p1100_p1, %p1099_p0 }
  0x42   :  { %p1102_p3 = pnand %p1101_p2, %p1095_p13 }
  0x44   :  { %1105 = shalt.err (!%p1102_p3)
}
  0x45   :  { %54 = dma.hbm_to_vmem [thread:$0]  %s1407_s2, 1024, %s1286_s30, [#allocation6], %s1183_s27, %s1183_s27, %s1184_s28  }
  0x46   :  { %s1190_s16 = smov [#allocation10]   ;;  %s1191_s19 = smov [#allocation11]  }
  0x47   :  { %s76_s17 = sshll.u32 %s1190_s16, 4  ;;  %s92_s20 = sshll.u32 %s1191_s19, 4  ;;  %s77_s17 = int_to_ptr.vmem [resolvable:$true] %s76_s17  ;;  %s1320_s20 = int_to_ptr.vmem [resolvable:$true] %s92_s20 }
  0x48   :  { %s1106_s21 = scalar_lea.hbm %s1411_s6, 8192 }
  0x49   :  { %p1107_p4 = scmp.ne.s32.totalorder %s1411_s6, %s1106_s21  ;;  %p1110_p5 = scmp.lt.u32.totalorder %s1106_s21, %s1411_s6 }
  0x4b   :  { %p1112_p6 = pnand %p1110_p5, %p1107_p4 }
  0x4d   :  { %1115 = shalt.err (!%p1112_p6)
}
  0x4e   :  { %s1116_s2 = scalar_lea.vmem %s77_s17, 8192  ;;  %p1121_p8 = scmp.lt.s32.totalorder %s77_s17, %s77_s17 }
  0x4f   :  { %p1117_p7 = scmp.ne.s32.totalorder %s77_s17, %s1116_s2  ;;  %p1122_p9 = scmp.lt.s32.totalorder %s1116_s2, %s1116_s2 }
  0x51   :  { %p1123_p10 = por %p1122_p9, %p1121_p8 }
  0x53   :  { %p1124_p11 = pnand %p1123_p10, %p1117_p7 }
  0x55   :  { %1127 = shalt.err (!%p1124_p11)
}
  0x56   :  { %82 = dma.hbm_to_vmem [thread:$0]  %s1411_s6, 8192, %s77_s17, [#allocation9], %s1186_s1, %s1186_s1, %s1187_s18  }
  0x57   :  { %s1128_s15 = scalar_lea.hbm %s1414_s9, 4096 }
  0x58   :  { %p1129_p12 = scmp.ne.s32.totalorder %s1414_s9, %s1128_s15  ;;  %p1132_p13 = scmp.lt.u32.totalorder %s1128_s15, %s1414_s9 }
  0x5a   :  { %p1134_p0 = pnand %p1132_p13, %p1129_p12 }
  0x5c   :  { %1137 = shalt.err (!%p1134_p0)
}
  0x5d   :  { %s1138_s5 = scalar_lea.vmem %s1320_s20, 4096  ;;  %p1143_p2 = scmp.lt.s32.totalorder %s1320_s20, %s1320_s20 }
  0x5e   :  { %p1139_p1 = scmp.ne.s32.totalorder %s1320_s20, %s1138_s5  ;;  %p1144_p3 = scmp.lt.s32.totalorder %s1138_s5, %s1138_s5 }
  0x60   :  { %p1145_p4 = por %p1144_p3, %p1143_p2 }
  0x62   :  { %p1146_p5 = pnand %p1145_p4, %p1139_p1 }
  0x64   :  { %1149 = shalt.err (!%p1146_p5)
}
  0x65   :  { %98 = dma.hbm_to_vmem [thread:$0]  %s1414_s9, 4096, %s1320_s20, [#allocation12], %s1183_s27, %s1183_s27, %s1184_s28  }
  0x66   :  { %1172 = dma.done.wait [#allocation3], 128  }
  0x67   :  { %1173 = vsyncadd [#allocation3], 4294967168 }
  0x68   :  { %1174 = dma.done.wait [#allocation6], 1536  }
  0x69   :  { %1175 = vsyncadd [#allocation6], 4294965760 }
  0x6a   :  { %1176 = dma.done.wait [#allocation9], 10240  }
  0x6b   :  { %1177 = vsyncadd [#allocation9], 4294957056 }
  0x6c   :  { %1178 = dma.done.wait [#allocation12], 4096  }
  0x6d   :  { %1179 = vsyncadd [#allocation12], 4294963200  ;;  %v1192_v0 = vmov 0.0|0.0   ;;  %vm1193_vm0 = vmmov 0   ;;  %v1194_v1 = vmov 0.0   ;;  %v120_v2 = vld [vmem:[#allocation5] sm:$0xff] }
  0x6e   :  { %848 = vmatprep.subr.bf16.mxu0 %v1192_v0  ;;  %826 = vmatprep.mubr.msk.f32.mxu0 %vm1193_vm0, %v1194_v1  ;;  %v121_v3 = vld [vmem:[#allocation5 + $0x8] sm:$0xff]  ;;  %v122_v4 = vld [vmem:[#allocation5 + $0x10] sm:$0xff]  ;;  %v123_v6 = vld [vmem:[#allocation5 + $0x18] sm:$0xff]  ;;  %vm124_vm1 = vcmask 261120   ;;  %vm209_vm2 = vcmask 523264   ;;  %s1195_s13 = smov [#allocation13]  }
  0x6f   :  { %v849_v5 = vpack.c.bf16 %v121_v3, %v120_v2  ;;  %v198_v7 = vld [vmem:[#allocation7] sm:$0xff]  ;;  %v199_v8 = vld [vmem:[#allocation7 + $0x8] sm:$0xff]  ;;  %v852_v9 = vpack.c.bf16 %v123_v6, %v122_v4  ;;  %v200_v11 = vld [vmem:[#allocation7 + $0x10] sm:$0xff]  ;;  %s745_s21 = sshll.u32 %s1195_s13, 4  ;;  %s746_s21 = int_to_ptr.vmem [resolvable:$true] %s745_s21 }
  0x70   :  { %v854_v10 = vpack.c.bf16 %v199_v8, %v198_v7  ;;  %v201_v12 = vld [vmem:[#allocation7 + $0x18] sm:$0xff]  ;;  %v202_v15 = vld [vmem:[#allocation7 + $0x20] sm:$0xff]  ;;  %v203_v16 = vld [vmem:[#allocation7 + $0x28] sm:$0xff]  ;;  %p1155_p7 = scmp.lt.s32.totalorder %s746_s21, %s746_s21 }
  0x71   :  { %850 = vmatpush3.bf16.msra.mxu0 %v849_v5  ;;  %v119_v13 = vld [vmem:[#allocation2] sm:$0xff]  ;;  %v858_v14 = vpack.c.bf16 %v201_v12, %v200_v11  ;;  %v862_v17 = vpack.c.bf16 %v203_v16, %v202_v15  ;;  %v204_v18 = vld [vmem:[#allocation7 + $0x30] sm:$0xff]  ;;  %v320_v24 = vld [vmem:[#allocation8 + $0x8] sm:$0xff] }
  0x72   :  { %851 = vmatprep.subr.bf16.mxu0 %v1192_v0  ;;  %v205_v19 = vld [vmem:[#allocation7 + $0x38] sm:$0xff]  ;;  %v319_v27 = vld [vmem:[#allocation8] sm:$0xff]  ;;  %v321_v28 = vld [vmem:[#allocation8 + $0x10] sm:$0xff] }
  0x73   :  { %v866_v20 = vpack.c.bf16 %v205_v19, %v204_v18  ;;  %v322_v25 = vld [vmem:[#allocation8 + $0x18] sm:$0xff]  ;;  %v872_v29 = vpack.c.bf16 %v321_v28, %v319_v27  ;;  %v324_v30 = vld [vmem:[#allocation8 + $0x28] sm:$0xff]  ;;  %v323_v33 = vld [vmem:[#allocation8 + $0x20] sm:$0xff] }
  0x74   :  { %v870_v26 = vpack.c.bf16 %v322_v25, %v320_v24  ;;  %v326_v31 = vld [vmem:[#allocation8 + $0x38] sm:$0xff]  ;;  %v325_v34 = vld [vmem:[#allocation8 + $0x30] sm:$0xff]  ;;  %v328_v36 = vld [vmem:[#allocation8 + $0x48] sm:$0xff] }
  0x75   :  { %853 = vmatpush3.bf16.msra.mxu0 %v852_v9  ;;  %v874_v32 = vpack.c.bf16 %v326_v31, %v324_v30  ;;  %v876_v35 = vpack.c.bf16 %v325_v34, %v323_v33  ;;  %v330_v37 = vld [vmem:[#allocation8 + $0x58] sm:$0xff]  ;;  %v327_v39 = vld [vmem:[#allocation8 + $0x40] sm:$0xff]  ;;  %v329_v40 = vld [vmem:[#allocation8 + $0x50] sm:$0xff] }
  0x76   :  { %855 = vmatprep.subr.bf16.mxu0 %v854_v10  ;;  %v878_v38 = vpack.c.bf16 %v330_v37, %v328_v36  ;;  %v880_v41 = vpack.c.bf16 %v329_v40, %v327_v39  ;;  %v332_v42 = vld [vmem:[#allocation8 + $0x68] sm:$0xff]  ;;  %v334_v43 = vld [vmem:[#allocation8 + $0x78] sm:$0xff]  ;;  %v331_v45 = vld [vmem:[#allocation8 + $0x60] sm:$0xff] }
  0x77   :  { %v882_v44 = vpack.c.bf16 %v334_v43, %v332_v42  ;;  %v333_v46 = vld [vmem:[#allocation8 + $0x70] sm:$0xff]  ;;  %v410_v48 = vld [vmem:[#allocation10 + $0x8] sm:$0xff]  ;;  %v412_v49 = vld [vmem:[#allocation10 + $0x18] sm:$0xff] }
  0x78   :  { %827 = vmatmul.mubr.msk.f32.vlgmr.msra.gmra.mrb[0].mxu0 %vm124_vm1, %v119_v13  ;;  %v884_v47 = vpack.c.bf16 %v333_v46, %v331_v45  ;;  %v409_v50 = vld [vmem:[#allocation10] sm:$0xff]  ;;  %v886_v51 = vpack.c.bf16 %v412_v49, %v410_v48  ;;  %v411_v52 = vld [vmem:[#allocation10 + $0x10] sm:$0xff]  ;;  %v414_v53 = vld [vmem:[#allocation10 + $0x28] sm:$0xff] }
  0x79   :  { %857 = vmatpush3.bf16.msra.mxu0 %v854_v10  ;;  %v416_v54 = vld [vmem:[#allocation10 + $0x38] sm:$0xff]  ;;  %v888_v55 = vpack.c.bf16 %v411_v52, %v409_v50  ;;  %v413_v57 = vld [vmem:[#allocation10 + $0x20] sm:$0xff]  ;;  %v415_v58 = vld [vmem:[#allocation10 + $0x30] sm:$0xff] }
  0x7a   :  { %859 = vmatprep.subr.bf16.mxu0 %v858_v14  ;;  %v890_v56 = vpack.c.bf16 %v416_v54, %v414_v53  ;;  %v418_v59 = vld [vmem:[#allocation10 + $0x48] sm:$0xff]  ;;  %887 = vmatprep.subr.bf16.mxu1 %v886_v51  ;;  %v420_v60 = vld [vmem:[#allocation10 + $0x58] sm:$0xff]  ;;  %v892_v61 = vpack.c.bf16 %v415_v58, %v413_v57  ;;  %v417_v63 = vld [vmem:[#allocation10 + $0x40] sm:$0xff] }
  0x7b   :  { %889 = vmatpush1.bf16.msra.mxu1 %v888_v55  ;;  %v894_v62 = vpack.c.bf16 %v420_v60, %v418_v59  ;;  %v419_v0 = vld [vmem:[#allocation10 + $0x50] sm:$0xff]  ;;  %v424_v2 = vld [vmem:[#allocation10 + $0x78] sm:$0xff]  ;;  %v421_v5 = vld [vmem:[#allocation10 + $0x60] sm:$0xff] }
  0x7c   :  { %891 = vmatprep.subr.bf16.mxu1 %v890_v56  ;;  %v896_v3 = vpack.c.bf16 %v419_v0, %v417_v63  ;;  %v423_v6 = vld [vmem:[#allocation10 + $0x70] sm:$0xff]  ;;  %v426_v7 = vld [vmem:[#allocation10 + $0x88] sm:$0xff]  ;;  %v428_v8 = vld [vmem:[#allocation10 + $0x98] sm:$0xff] }
  0x7d   :  { %861 = vmatpush3.bf16.msra.mxu0 %v858_v14  ;;  %v900_v9 = vpack.c.bf16 %v423_v6, %v421_v5  ;;  %v902_v10 = vpack.c.bf16 %v428_v8, %v426_v7  ;;  %v425_v11 = vld [vmem:[#allocation10 + $0x80] sm:$0xff]  ;;  %v427_v12 = vld [vmem:[#allocation10 + $0x90] sm:$0xff]  ;;  %v430_v13 = vld [vmem:[#allocation10 + $0xa8] sm:$0xff] }
  0x7e   :  { %863 = vmatprep.subr.bf16.mxu0 %v862_v17  ;;  %v432_v14 = vld [vmem:[#allocation10 + $0xb8] sm:$0xff]  ;;  %v904_v15 = vpack.c.bf16 %v427_v12, %v425_v11  ;;  %v431_v18 = vld [vmem:[#allocation10 + $0xb0] sm:$0xff]  ;;  %v434_v19 = vld [vmem:[#allocation10 + $0xc8] sm:$0xff] }
  0x7f   :  { %893 = vmatpush1.bf16.msra.mxu1 %v892_v61  ;;  %v906_v16 = vpack.c.bf16 %v432_v14, %v430_v13  ;;  %v433_v24 = vld [vmem:[#allocation10 + $0xc0] sm:$0xff]  ;;  %v435_v25 = vld [vmem:[#allocation10 + $0xd0] sm:$0xff]  ;;  %v440_v27 = vld [vmem:[#allocation10 + $0xf8] sm:$0xff] }
  0x80   :  { %895 = vmatprep.subr.bf16.mxu1 %v894_v62  ;;  %v912_v28 = vpack.c.bf16 %v435_v25, %v433_v24  ;;  %v437_v30 = vld [vmem:[#allocation10 + $0xe0] sm:$0xff]  ;;  %v439_v31 = vld [vmem:[#allocation10 + $0xf0] sm:$0xff]  ;;  %v444_v33 = vld [vmem:[#allocation10 + $0x118] sm:$0xff] }
  0x81   :  { %865 = vmatpush3.bf16.msra.mxu0 %v862_v17  ;;  %v429_v17 = vld [vmem:[#allocation10 + $0xa0] sm:$0xff]  ;;  %v916_v34 = vpack.c.bf16 %v439_v31, %v437_v30  ;;  %v443_v37 = vld [vmem:[#allocation10 + $0x110] sm:$0xff]  ;;  %v448_v39 = vld [vmem:[#allocation10 + $0x138] sm:$0xff] }
  0x82   :  { %867 = vmatprep.subr.bf16.mxu0 %v866_v20  ;;  %v441_v36 = vld [vmem:[#allocation10 + $0x100] sm:$0xff]  ;;  %v447_v43 = vld [vmem:[#allocation10 + $0x130] sm:$0xff]  ;;  %v452_v45 = vld [vmem:[#allocation10 + $0x158] sm:$0xff] }
  0x83   :  { %897 = vmatpush1.bf16.msra.mxu1 %v896_v3  ;;  %v920_v40 = vpack.c.bf16 %v443_v37, %v441_v36  ;;  %v445_v42 = vld [vmem:[#allocation10 + $0x120] sm:$0xff]  ;;  %v451_v49 = vld [vmem:[#allocation10 + $0x150] sm:$0xff]  ;;  %v454_v50 = vld [vmem:[#allocation10 + $0x168] sm:$0xff] }
  0x84   :  { %v924_v46 = vpack.c.bf16 %v447_v43, %v445_v42  ;;  %v449_v48 = vld [vmem:[#allocation10 + $0x140] sm:$0xff]  ;;  %v456_v51 = vld [vmem:[#allocation10 + $0x178] sm:$0xff]  ;;  %v455_v55 = vld [vmem:[#allocation10 + $0x170] sm:$0xff] }
  0x85   :  { %869 = vmatpush3.bf16.msra.mxu0 %v866_v20  ;;  %v436_v20 = vld [vmem:[#allocation10 + $0xd8] sm:$0xff]  ;;  %v928_v52 = vpack.c.bf16 %v451_v49, %v449_v48  ;;  %v930_v53 = vpack.c.bf16 %v456_v51, %v454_v50  ;;  %v453_v54 = vld [vmem:[#allocation10 + $0x160] sm:$0xff]  ;;  %v458_v56 = vld [vmem:[#allocation10 + $0x188] sm:$0xff] }
  0x86   :  { %871 = vmatprep.subr.bf16.mxu0 %v870_v26  ;;  %v438_v26 = vld [vmem:[#allocation10 + $0xe8] sm:$0xff]  ;;  %v460_v57 = vld [vmem:[#allocation10 + $0x198] sm:$0xff]  ;;  %v932_v58 = vpack.c.bf16 %v455_v55, %v453_v54  ;;  %v457_v60 = vld [vmem:[#allocation10 + $0x180] sm:$0xff] }
  0x87   :  { %v934_v59 = vpack.c.bf16 %v460_v57, %v458_v56  ;;  %v459_v61 = vld [vmem:[#allocation10 + $0x190] sm:$0xff]  ;;  %v462_v62 = vld [vmem:[#allocation10 + $0x1a8] sm:$0xff]  ;;  %v464_v63 = vld [vmem:[#allocation10 + $0x1b8] sm:$0xff] }
  0x88   :  { %v936_v0 = vpack.c.bf16 %v459_v61, %v457_v60  ;;  %v463_v3 = vld [vmem:[#allocation10 + $0x1b0] sm:$0xff]  ;;  %v468_v5 = vld [vmem:[#allocation10 + $0x1d8] sm:$0xff]  ;;  %v465_v8 = vld [vmem:[#allocation10 + $0x1c0] sm:$0xff] }
  0x89   :  { %v472_v11 = vld [vmem:[#allocation10 + $0x1f8] sm:$0xff]  ;;  %v609_v43 = vld [vmem:[#allocation11 + $0x8] sm:$0xff]  ;;  %v610_v48 = vld [vmem:[#allocation11 + $0x10] sm:$0xff] }
  0x8a   :  { %v761_v25 = vld [vmem:[%s1409_s4] ss:$0 sm:$0xff]  ;;  %v628_v50 = vld [vmem:[#allocation11 + $0xa0] sm:$0xff]  ;;  %v629_v51 = vld [vmem:[#allocation11 + $0xa8] sm:$0xff] }
  0x8b   :  { %v611_v49 = vld [vmem:[#allocation11 + $0x18] sm:$0xff]  ;;  %v612_v54 = vld [vmem:[#allocation11 + $0x20] sm:$0xff]  ;;  %v613_v55 = vld [vmem:[#allocation11 + $0x28] sm:$0xff] }
  0x8c   :  { %v630_v56 = vld [vmem:[#allocation11 + $0xb0] sm:$0xff]  ;;  %v631_v57 = vld [vmem:[#allocation11 + $0xb8] sm:$0xff] }
  0x8d   :  { %v614_v60 = vld [vmem:[#allocation11 + $0x30] sm:$0xff]  ;;  %v615_v61 = vld [vmem:[#allocation11 + $0x38] sm:$0xff] }
 0x14b   :  { %v1357_v21 = vpop.f32.mrb[0].mxu0 }
 0x14c   :  { %v208_v22 = vmul.f32 %v1357_v21, %v1357_v21  ;;  %v828_v23 = vpop.f32.mrb[1].mxu0  ;;  %845 = vmatprep.mubr.msk.f32.mxu0 %vm209_vm2, %v1357_v21 }
 0x14d   :  { %v910_v23 = vpack.c.bf16 %v436_v20, %v434_v19 }
 0x14e   :  { %846 = vmatmul.mubr.msk.f32.vlgmr.msra.gmra.mrb[2].mxu0 %vm209_vm2, %v208_v22  ;;  %v908_v22 = vpack.c.bf16 %v431_v18, %v429_v17 }
 0x14f   :  { %402 = vmatprep.mubr.f32.mxu0 %v1194_v1  ;;  %873 = vmatpush1.bf16.msra.mxu0 %v872_v29  ;;  %v422_v1 = vld [vmem:[#allocation10 + $0x68] sm:$0xff]  ;;  %v914_v29 = vpack.c.bf16 %v440_v27, %v438_v26 }
 0x150   :  { %875 = vmatprep.subr.bf16.mxu0 %v874_v32  ;;  %v898_v4 = vpack.c.bf16 %v424_v2, %v422_v1  ;;  %v442_v32 = vld [vmem:[#allocation10 + $0x108] sm:$0xff]  ;;  %v938_v1 = vpack.c.bf16 %v464_v63, %v462_v62  ;;  %v461_v2 = vld [vmem:[#allocation10 + $0x1a0] sm:$0xff] }
 0x151   :  { %v940_v6 = vpack.c.bf16 %v463_v3, %v461_v2  ;;  %v632_v62 = vld [vmem:[#allocation11 + $0xc0] sm:$0xff]  ;;  %v633_v63 = vld [vmem:[#allocation11 + $0xc8] sm:$0xff] }
 0x152   :  { %899 = vmatprep.subr.bf16.mxu1 %v898_v4  ;;  %v466_v4 = vld [vmem:[#allocation10 + $0x1c8] sm:$0xff]  ;;  %v616_v2 = vld [vmem:[#allocation11 + $0x40] sm:$0xff] }
 0x153   :  { %877 = vmatpush1.bf16.msra.mxu0 %v876_v35  ;;  %901 = vmatpush1.bf16.msra.mxu1 %v900_v9  ;;  %v918_v35 = vpack.c.bf16 %v444_v33, %v442_v32  ;;  %v942_v7 = vpack.c.bf16 %v468_v5, %v466_v4  ;;  %v467_v9 = vld [vmem:[#allocation10 + $0x1d0] sm:$0xff]  ;;  %v469_v32 = vld [vmem:[#allocation10 + $0x1e0] sm:$0xff]  ;;  %v617_v3 = vld [vmem:[#allocation11 + $0x48] sm:$0xff] }
 0x154   :  { %879 = vmatprep.subr.bf16.mxu0 %v878_v38  ;;  %903 = vmatprep.subr.bf16.mxu1 %v902_v10  ;;  %v446_v38 = vld [vmem:[#allocation10 + $0x128] sm:$0xff]  ;;  %v944_v12 = vpack.c.bf16 %v467_v9, %v465_v8  ;;  %v471_v33 = vld [vmem:[#allocation10 + $0x1f0] sm:$0xff]  ;;  %v635_v5 = vld [vmem:[#allocation11 + $0xd8] sm:$0xff] }
 0x155   :  { %v470_v10 = vld [vmem:[#allocation10 + $0x1e8] sm:$0xff]  ;;  %v634_v4 = vld [vmem:[#allocation11 + $0xd0] sm:$0xff]  ;;  %v619_v9 = vld [vmem:[#allocation11 + $0x58] sm:$0xff] }
 0x156   :  { %v946_v13 = vpack.c.bf16 %v472_v11, %v470_v10  ;;  %v618_v8 = vld [vmem:[#allocation11 + $0x50] sm:$0xff]  ;;  %v636_v10 = vld [vmem:[#allocation11 + $0xe0] sm:$0xff]  ;;  %v637_v11 = vld [vmem:[#allocation11 + $0xe8] sm:$0xff] }
 0x157   :  { %881 = vmatpush1.bf16.msra.mxu0 %v880_v41  ;;  %905 = vmatpush1.bf16.msra.mxu1 %v904_v15  ;;  %v922_v41 = vpack.c.bf16 %v448_v39, %v446_v38  ;;  %v624_v39 = vld [vmem:[#allocation11 + $0x80] sm:$0xff] }
 0x158   :  { %883 = vmatprep.subr.bf16.mxu0 %v882_v44  ;;  %907 = vmatprep.subr.bf16.mxu1 %v906_v16  ;;  %v450_v44 = vld [vmem:[#allocation10 + $0x148] sm:$0xff] }
 0x15b   :  { %885 = vmatpush1.bf16.msra.mxu0 %v884_v47  ;;  %909 = vmatpush1.bf16.msra.mxu1 %v908_v22  ;;  %v926_v47 = vpack.c.bf16 %v452_v45, %v450_v44  ;;  %v626_v44 = vld [vmem:[#allocation11 + $0x90] sm:$0xff]  ;;  %v627_v45 = vld [vmem:[#allocation11 + $0x98] sm:$0xff] }
 0x15c   :  { %911 = vmatprep.subr.bf16.mxu1 %v910_v23  ;;  %v760_v23 = vld [vmem:[%s1408_s3] ss:$0 sm:$0xff] }
 0x15f   :  { %913 = vmatpush1.bf16.msra.mxu1 %v912_v28 }
 0x160   :  { %915 = vmatprep.subr.bf16.mxu1 %v914_v29 }
 0x163   :  { %917 = vmatpush1.bf16.msra.mxu1 %v916_v34  ;;  %v948_v34 = vpack.c.bf16 %v471_v33, %v469_v32 }
 0x164   :  { %919 = vmatprep.subr.bf16.mxu1 %v918_v35 }
 0x167   :  { %921 = vmatpush1.bf16.msra.mxu1 %v920_v40  ;;  %v625_v40 = vld [vmem:[#allocation11 + $0x88] sm:$0xff] }
 0x168   :  { %923 = vmatprep.subr.bf16.mxu1 %v922_v41  ;;  %v608_v41 = vld [vmem:[#allocation11] sm:$0xff]  ;;  %v950_v42 = vpack.c.bf16 %v625_v40, %v624_v39 }
 0x16a   :  { %951 = vmatprep.subr.bf16.mxu0 %v950_v42  ;;  %v474_v42 = vld [vmem:[%s1413_s8] sm:$0x3] }
 0x16b   :  { %925 = vmatpush1.bf16.msra.mxu1 %v924_v46  ;;  %v952_v46 = vpack.c.bf16 %v609_v43, %v608_v41 }
 0x16c   :  { %927 = vmatprep.subr.bf16.mxu1 %v926_v47  ;;  %v954_v47 = vpack.c.bf16 %v627_v45, %v626_v44 }
 0x16f   :  { %929 = vmatpush1.bf16.msra.mxu1 %v928_v52  ;;  %v956_v52 = vpack.c.bf16 %v611_v49, %v610_v48 }
 0x170   :  { %931 = vmatprep.subr.bf16.mxu1 %v930_v53  ;;  %v958_v53 = vpack.c.bf16 %v629_v51, %v628_v50 }
 0x173   :  { %933 = vmatpush1.bf16.msra.mxu1 %v932_v58  ;;  %v960_v58 = vpack.c.bf16 %v613_v55, %v612_v54 }
 0x174   :  { %935 = vmatprep.subr.bf16.mxu1 %v934_v59  ;;  %v962_v59 = vpack.c.bf16 %v631_v57, %v630_v56 }
 0x177   :  { %937 = vmatpush1.bf16.msra.mxu1 %v936_v0  ;;  %v964_v0 = vpack.c.bf16 %v615_v61, %v614_v60 }
 0x178   :  { %939 = vmatprep.subr.bf16.mxu1 %v938_v1  ;;  %v966_v1 = vpack.c.bf16 %v633_v63, %v632_v62 }
 0x17b   :  { %941 = vmatpush1.bf16.msra.mxu1 %v940_v6  ;;  %v968_v6 = vpack.c.bf16 %v617_v3, %v616_v2  ;;  %v766_v2 = vld [vmem:[%s1415_s10] ss:$0 sm:$0xff]  ;;  %s1150_s10 = scalar_lea.vmem %s746_s21, 128 }
 0x17c   :  { %943 = vmatprep.subr.bf16.mxu1 %v942_v7  ;;  %v970_v7 = vpack.c.bf16 %v635_v5, %v634_v4  ;;  %p1151_p6 = scmp.ne.s32.totalorder %s746_s21, %s1150_s10  ;;  %p1156_p8 = scmp.lt.s32.totalorder %s1150_s10, %s1150_s10 }
 0x17e   :  { %p1157_p9 = por %p1156_p8, %p1155_p7 }
 0x17f   :  { %945 = vmatpush1.bf16.msra.mxu1 %v944_v12  ;;  %v972_v12 = vpack.c.bf16 %v619_v9, %v618_v8 }
 0x180   :  { %947 = vmatprep.subr.bf16.mxu1 %v946_v13  ;;  %v974_v13 = vpack.c.bf16 %v637_v11, %v636_v10  ;;  %p1158_p10 = pnand %p1157_p9, %p1151_p6 }
 0x183   :  { %949 = vmatpush1.bf16.msra.mxu1 %v948_v34 }
 0x221   :  { %v847_v14 = vpop.f32.mrb[2].mxu0 }
 0x222   :  { %v282_v15 = vpop.f32.mrb[3].mxu0 }
 0x223   :  { %v291_v16 = vmul.f32 %v282_v15, %v282_v15  ;;  %v294_v17 = vsub.f32 %v1357_v21, %v282_v15  ;;  %v621_v15 = vld [vmem:[#allocation11 + $0x68] sm:$0xff] }
 0x225   :  { %v292_v18 = vsub.f32 %v847_v14, %v291_v16  ;;  %v620_v14 = vld [vmem:[#allocation11 + $0x60] sm:$0xff]  ;;  %v638_v16 = vld [vmem:[#allocation11 + $0xf0] sm:$0xff] }
 0x227   :  { %v293_v19 = vmax.f32 %v292_v18, 0.0  ;;  %v976_v18 = vpack.c.bf16 %v621_v15, %v620_v14 }
 0x229   :  { %v295_v20 = vadd.f32 1e-05, %v293_v19 }
 0x22b   :  { %996 = vrsqrt.f32 %v295_v20  ;;  %v622_v20 = vld [vmem:[#allocation11 + $0x70] sm:$0xff] }
 0x235   :  { %v997_v22 = vpop.eup %996 }
 0x236   :  { %v297_v24 = vmul.f32 %v997_v22, %v294_v17  ;;  %v639_v17 = vld [vmem:[#allocation11 + $0xf8] sm:$0xff] }
 0x237   :  { %v978_v19 = vpack.c.bf16 %v639_v17, %v638_v16  ;;  %v623_v22 = vld [vmem:[#allocation11 + $0x78] sm:$0xff] }
 0x238   :  { %v304_v26 = vmul.f32 %v760_v23, %v297_v24  ;;  %v980_v23 = vpack.c.bf16 %v623_v22, %v622_v20 }
 0x23a   :  { %v311_v27 = vadd.f32 %v761_v25, %v304_v26 }
 0x23c   :  { %v762_v28 = vmul.f32 -1.442695, %v311_v27 }
 0x23e   :  { %998 = vpow2.f32 %v762_v28 }
 0x248   :  { %v999_v29 = vpop.eup %998 }
 0x249   :  { %v315_v21 = vadd.f32 1.0, %v999_v29 }
 0x24b   :  { %1000 = vrcp.f32 %v315_v21 }
 0x255   :  { %v1001_v30 = vpop.eup %1000 }
 0x256   :  { %v318_v31 = vmul.f32 %v1001_v30, %v311_v27 }
 0x258   :  { %763 = vmatmul.mubr.msk.f32.vlgmr.msra.gmra.mrb[4].mxu0 %vm209_vm2, %v318_v31 }
 0x259   :  { %953 = vmatpush3.bf16.msra.mxu0 %v952_v46 }
 0x25a   :  { %955 = vmatprep.subr.bf16.mxu0 %v954_v47 }
 0x25d   :  { %957 = vmatpush3.bf16.msra.mxu0 %v956_v52 }
 0x25e   :  { %959 = vmatprep.subr.bf16.mxu0 %v958_v53 }
 0x261   :  { %961 = vmatpush3.bf16.msra.mxu0 %v960_v58 }
 0x262   :  { %963 = vmatprep.subr.bf16.mxu0 %v962_v59 }
 0x265   :  { %965 = vmatpush3.bf16.msra.mxu0 %v964_v0 }
 0x266   :  { %967 = vmatprep.subr.bf16.mxu0 %v966_v1 }
 0x269   :  { %969 = vmatpush3.bf16.msra.mxu0 %v968_v6 }
 0x26a   :  { %971 = vmatprep.subr.bf16.mxu0 %v970_v7 }
 0x26d   :  { %973 = vmatpush3.bf16.msra.mxu0 %v972_v12 }
 0x26e   :  { %975 = vmatprep.subr.bf16.mxu0 %v974_v13 }
 0x271   :  { %977 = vmatpush3.bf16.msra.mxu0 %v976_v18 }
 0x272   :  { %979 = vmatprep.subr.bf16.mxu0 %v978_v19 }
 0x275   :  { %981 = vmatpush3.bf16.msra.mxu0 %v980_v23 }
 0x32b   :  { %v1372_v35 = vpop.f32.mrb[4].mxu0 }
 0x32c   :  { %v1374_v36 = vpop.f32.mrb[5].mxu0  ;;  %v475_v38 = vmul.f32 %v1372_v35, %v1372_v35 }
 0x32d   :  { %v476_v37 = vmul.f32 %v1374_v36, %v1374_v36  ;;  %541 = vmatprep.mubr.f32.mxu1 %v1374_v36 }
 0x32e   :  { %542 = vmatmul.mubr.f32.vlgmr.msra.gmra.mrb[0].mxu1 %v1372_v35 }
 0x32f   :  { %547 = vmatprep.mubr.f32.mxu1 %v476_v37  ;;  %v569_v37 = vlaneseq }
 0x331   :  { %v570_v40 = vshrl.u32 %v569_v37, 7  ;;  %v718_v11 = vand.u32 127, %v569_v37 }
 0x332   :  { %548 = vmatmul.mubr.f32.gmra.mrb[2].mxu1 %v475_v38 }
 0x333   :  { %v571_v41 = vsub.s32 0, %v570_v40  ;;  %vm719_vm3 = vcmp.ge.s32.totalorder %v718_v11, 4  ;;  %vm720_vm4 = vcmp.lt.s32.totalorder %v718_v11, 8 }
 0x334   :  { %vm721_vm5 = vmand %vm719_vm3, %vm720_vm4 }
 0x335   :  { %v585_v48 = vrot.slane %v474_v42, %v571_v41 }
 0x401   :  { %v543_v24 = vpop.f32.mrb[0].mxu1 }
 0x402   :  { %v560_v25 = vsub.f32 %v1372_v35, %v543_v24  ;;  %v545_v26 = vpop.f32.mrb[1].mxu1  ;;  %v554_v28 = vmul.f32 %v543_v24, %v543_v24  ;;  %v473_v35 = vld [vmem:[%s1412_s7] sm:$0x3] }
 0x403   :  { %v561_v27 = vsub.f32 %v1374_v36, %v545_v26  ;;  %v555_v29 = vmul.f32 %v545_v26, %v545_v26  ;;  %v575_v36 = vsub.s32 1, %v570_v40  ;;  %v572_v43 = vrot.slane %v473_v35, %v571_v41 }
 0x405   :  { %v549_v21 = vpop.f32.mrb[2].mxu1  ;;  %v576_v45 = vrot.slane %v473_v35, %v575_v36  ;;  %v589_v50 = vrot.slane %v474_v42, %v575_v36 }
 0x406   :  { %v556_v30 = vsub.f32 %v549_v21, %v554_v28  ;;  %v551_v31 = vpop.f32.mrb[3].mxu1 }
 0x407   :  { %v557_v32 = vsub.f32 %v551_v31, %v555_v29 }
 0x408   :  { %v558_v33 = vmax.f32 %v556_v30, 0.0 }
 0x409   :  { %v559_v34 = vmax.f32 %v557_v32, 0.0 }
 0x40a   :  { %v562_v38 = vadd.f32 1e-05, %v558_v33 }
 0x40b   :  { %v563_v39 = vadd.f32 1e-05, %v559_v34 }
 0x40c   :  { %1002 = vrsqrt.f32 %v562_v38 }
 0x40d   :  { %1004 = vrsqrt.f32 %v563_v39 }
 0x416   :  { %v1003_v44 = vpop.eup %1002 }
 0x417   :  { %v1005_v46 = vpop.eup %1004  ;;  %v566_v47 = vmul.f32 %v1003_v44, %v560_v25 }
 0x418   :  { %v567_v49 = vmul.f32 %v1005_v46, %v561_v27 }
 0x419   :  { %v579_v51 = vmul.f32 %v572_v43, %v566_v47 }
 0x41a   :  { %v580_v52 = vmul.f32 %v576_v45, %v567_v49 }
 0x41b   :  { %v592_v53 = vadd.f32 %v585_v48, %v579_v51 }
 0x41c   :  { %v593_v54 = vadd.f32 %v589_v50, %v580_v52 }
 0x41d   :  { %v764_v55 = vmul.f32 -1.442695, %v592_v53 }
 0x41e   :  { %v765_v56 = vmul.f32 -1.442695, %v593_v54 }
 0x41f   :  { %1006 = vpow2.f32 %v764_v55 }
 0x420   :  { %1008 = vpow2.f32 %v765_v56 }
 0x429   :  { %v1007_v57 = vpop.eup %1006 }
 0x42a   :  { %v1009_v58 = vpop.eup %1008  ;;  %v600_v59 = vadd.f32 1.0, %v1007_v57 }
 0x42b   :  { %v601_v60 = vadd.f32 1.0, %v1009_v58 }
 0x42c   :  { %1010 = vrcp.f32 %v600_v59 }
 0x42d   :  { %1012 = vrcp.f32 %v601_v60 }
 0x436   :  { %v1011_v61 = vpop.eup %1010 }
 0x437   :  { %v1013_v62 = vpop.eup %1012  ;;  %v606_v0 = vmul.f32 %v1011_v61, %v592_v53 }
 0x438   :  { %v607_v63 = vmul.f32 %v1013_v62, %v593_v54 }
 0x43a   :  { %711 = vmatprep.mubr.f32.mxu0 %v607_v63 }
 0x43b   :  { %712 = vmatmul.mubr.f32.vlgmr.msra.gmra.mrb[6].mxu0 %v606_v0 }
 0x50e   :  { %v815_v1 = vpop.f32.mrb[6].mxu0 }
 0x50f   :  { %v816_v3 = vpop.f32.mrb[7].mxu0 }
 0x510   :  { %v817_v4 = vadd.f32 %v816_v3, %v815_v1 }
 0x512   :  { %v714_v5 = vadd.f32 %v817_v4, %v766_v2 }
 0x514   :  { %v767_v6 = vclamps-f32 %v714_v5, 2.0 }
 0x516   :  { %v724_v7 = vmul.f32 1.442695, %v767_v6 }
 0x518   :  { %1014 = vpow2.f32 %v724_v7 }
 0x522   :  { %v1015_v8 = vpop.eup %1014 }
 0x523   :  { %v726_v9 = vadd.f32 1.0, %v1015_v8  ;;  %v729_v10 = vmul.f32 -0.5, %v1015_v8  ;;  %v732_v13 = vand.u32 2147483647, %v1015_v8 }
 0x525   :  { %1016 = vlog2.f32 %v726_v9  ;;  %v730_v12 = vadd.f32 1.0, %v729_v10  ;;  %vm733_vm6 = vcmp.lt.f32.partialorder %v732_v13, 0.0004427343 }
 0x527   :  { %v731_v16 = vmul.f32 %v1015_v8, %v730_v12 }
 0x52f   :  { %v1017_v14 = vpop.eup %1016 }
 0x530   :  { %v728_v15 = vmul.f32 0.6931472, %v1017_v14 }
 0x532   :  { %v734_v17 = vsel %vm733_vm6, %v731_v16, %v728_v15 }
 0x533   :  { %v737_v18 = vsel %vm721_vm5, %v734_v17, %v714_v5 }
 0x534   :  { %738 = vst [vmem:[#allocation13] sm:$0xff] %v737_v18 }
 0x535   :  { %1161 = shalt.err (!%p1158_p10)
}
 0x536   :  { %s1162_s24 = scalar_lea.hbm %s1416_s11, 128 }
 0x537   :  { %p1163_p11 = scmp.ne.s32.totalorder %s1416_s11, %s1162_s24  ;;  %p1166_p12 = scmp.lt.u32.totalorder %s1162_s24, %s1416_s11 }
 0x539   :  { %p1168_p13 = pnand %p1166_p12, %p1163_p11 }
 0x53b   :  { %1171 = shalt.err (!%p1168_p13)
}
 0x53c   :  { %748 = dma.vmem_to_hbm [thread:$0]  %s746_s21, 128, %s1416_s11, [#allocation4]  }
 0x53d   :  { %1180 = dma.done.wait [#allocation4], 128  }
 0x53e   :  { %1181 = vsyncadd [#allocation4], 4294967168 }
 0x53f   :  { %752 = vsyncpa [#allocation3], 1 }
 0x540   :  { %753 = vsyncpa [#allocation6], 1 }
 0x541   :  { %754 = vsyncpa [#allocation9], 1 }
 0x542   :  { %755 = vsyncpa [#allocation12], 1 }
 0x543   :  { %756 = vsyncpa [#allocation4], 1 }

</bundles_post_ra>
